<compile_context>
chip_gen: v6e
topology: v6e:2x2x1
jax: 0.10.0
libtpu: 0.0.40
codegen_flags: <defaults>
</compile_context>

<pallas_src>
import functools

import jax
import jax.numpy as jnp
from jax.experimental import pallas as pl
from jax.experimental.pallas import tpu as pltpu

HIDDEN_DIM = 128


def _stable_softplus(x):
    # Matches torch.nn.functional.softplus (threshold behavior) to <2e-9,
    # without computing exp() of large positive arguments.
    return jnp.maximum(x, 0.0) + jnp.log1p(jnp.exp(-jnp.abs(x)))


def _encoder_kernel(z_dim, inv_n, y_scale,
                    x1_ref, y_ref,
                    w1a_ref, w1b_ref, b1_ref,
                    w2_ref, b2_ref, w3_ref, b3_ref,
                    w4_ref, b4_ref, w5_ref, b5_ref,
                    w6_ref, b6_ref,
                    out_ref):
    mxu_dt = w1a_ref.dtype  # matmul-operand dtype (f32 or bf16)

    # First Linear with the concat folded in:
    #   cat([x1/n, (2-1/n)*y], 1) @ W1 == (x1/n) @ W1a + ((2-1/n)*y) @ W1b
    x1 = (x1_ref[...] * inv_n).astype(mxu_dt)
    yy = (y_ref[...] * y_scale).astype(mxu_dt)
    h0 = (jnp.dot(x1, w1a_ref[...], preferred_element_type=jnp.float32)
          + jnp.dot(yy, w1b_ref[...], preferred_element_type=jnp.float32)
          + b1_ref[...])

    def resnet_block(h_in, wa_ref, ba_ref, wb_ref, bb_ref):
        a = jnp.maximum(
            jnp.dot(h_in.astype(mxu_dt), wa_ref[...],
                    preferred_element_type=jnp.float32) + ba_ref[...], 0.0)
        b = jnp.maximum(
            jnp.dot(a.astype(mxu_dt), wb_ref[...],
                    preferred_element_type=jnp.float32) + bb_ref[...], 0.0)
        return b + h_in

    h = resnet_block(h0, w2_ref, b2_ref, w3_ref, b3_ref)
    h = resnet_block(h, w4_ref, b4_ref, w5_ref, b5_ref)

    out = jnp.dot(h.astype(mxu_dt), w6_ref[...],
                  preferred_element_type=jnp.float32) + b6_ref[...]

    # Lane-dense fused output: cols [0, z_dim) = mu, cols [z_dim, 2*z_dim) =
    # softplus(.) + 1e-7.  Padding columns (>= 2*z_dim) are discarded by the
    # wrapper, so applying softplus to them is harmless.
    col = jax.lax.broadcasted_iota(jnp.int32, out.shape, 1)
    out_ref[...] = jnp.where(col < z_dim, out, _stable_softplus(out) + 1e-07)


def init_params(key, input_dim, sub_dim, z_dim):
    """Deterministic synthetic parameters matching the module's shapes."""
    d0 = input_dim + sub_dim
    shapes = [
        (d0, HIDDEN_DIM),          # net[0]
        (HIDDEN_DIM, HIDDEN_DIM),  # resnet1 linear1
        (HIDDEN_DIM, HIDDEN_DIM),  # resnet1 linear2
        (HIDDEN_DIM, HIDDEN_DIM),  # resnet2 linear1
        (HIDDEN_DIM, HIDDEN_DIM),  # resnet2 linear2
        (HIDDEN_DIM, 2 * z_dim),   # net[3]
    ]
    params = []
    for i, (fan_in, fan_out) in enumerate(shapes):
        kw, kb = jax.random.split(jax.random.fold_in(key, i))
        w = jax.random.normal(kw, (fan_in, fan_out), jnp.float32) * 0.05
        b = jax.random.normal(kb, (1, fan_out), jnp.float32) * 0.05
        params.append((w, b))
    return params


def _pick_tile(n, tm_max):
    """Batch tile: as large as possible (<= tm_max), multiple of 8 sublanes;
    split small batches into two grid steps so v7x megacore can use both TCs."""
    n8 = pl.cdiv(n, 8) * 8
    if n8 > tm_max:
        return tm_max
    if n8 >= 16:
        return pl.cdiv(pl.cdiv(n8, 2), 8) * 8
    return n8


def bias_sub_graph_encoder(trunk_z_given_x, y, params, z_dim, *,
                           tm=256, mxu_dtype=jnp.bfloat16):
    """Replicates BiasSubGraphEncoder.forward as one fused Pallas kernel."""
    # torch.cat([a, b], dim=1) requires equal batch sizes.
    assert trunk_z_given_x.shape[0] == y.shape[0]
    n = y.shape[0]
    input_dim = trunk_z_given_x.shape[1]
    sub_dim = y.shape[1]
    node_num = y.shape[0] // trunk_z_given_x.shape[0]
    inv_n = 1.0 / node_num
    y_scale = 2.0 - 1.0 / node_num

    (w1, b1), (w2, b2), (w3, b3), (w4, b4), (w5, b5), (w6, b6) = params

    # Split the first Linear so the concatenated feature never hits HBM.
    w1a = w1[:input_dim]
    w1b = w1[input_dim:]

    # Pad the fused (mu | sigma) output width to a lane-dense multiple of 128.
    out2 = 2 * z_dim
    out_pad = pl.cdiv(out2, 128) * 128
    if out_pad != out2:
        w6 = jnp.pad(w6, ((0, 0), (0, out_pad - out2)))
        b6 = jnp.pad(b6, ((0, 0), (0, out_pad - out2)))

    # Matmul operands in mxu_dtype (bf16 on v6e/v7x); biases stay f32.
    w1a, w1b, w2, w3, w4, w5, w6 = (
        w.astype(mxu_dtype) for w in (w1a, w1b, w2, w3, w4, w5, w6))

    # Batch tiling / padding.
    tm_eff = _pick_tile(n, tm)
    n_pad = pl.cdiv(n, tm_eff) * tm_eff
    if n_pad != n:
        trunk_z_given_x = jnp.pad(trunk_z_given_x, ((0, n_pad - n), (0, 0)))
        y = jnp.pad(y, ((0, n_pad - n), (0, 0)))

    weight_args = [w1a, w1b, b1, w2, b2, w3, b3, w4, b4, w5, b5, w6, b6]
    vmem_spec = pl.BlockSpec(memory_space=pltpu.MemorySpace.VMEM)

    fused = pl.pallas_call(
        functools.partial(_encoder_kernel, z_dim, inv_n, y_scale),
        out_shape=jax.ShapeDtypeStruct((n_pad, out_pad), jnp.float32),
        grid_spec=pltpu.PrefetchScalarGridSpec(
            num_scalar_prefetch=0,
            grid=(n_pad // tm_eff,),
            in_specs=[pl.BlockSpec((tm_eff, input_dim), lambda i: (i, 0)),
                      pl.BlockSpec((tm_eff, sub_dim), lambda i: (i, 0))]
                     + [vmem_spec] * len(weight_args),
            out_specs=pl.BlockSpec((tm_eff, out_pad), lambda i: (i, 0)),
        ),
        compiler_params=pltpu.CompilerParams(
            dimension_semantics=("parallel",),
            vmem_limit_bytes=32 * 1024 * 1024),
    )(trunk_z_given_x, y, *weight_args)

    mu = fused[:n, :z_dim]
    sigma = fused[:n, z_dim:out2]
    return mu, sigma


def _reference(trunk_z_given_x, y, params, z_dim):
    node_num = y.shape[0] // trunk_z_given_x.shape[0]
    x = jnp.concatenate(
        [trunk_z_given_x / node_num, (2.0 - 1.0 / node_num) * y], axis=1)
    (w1, b1), (w2, b2), (w3, b3), (w4, b4), (w5, b5), (w6, b6) = params
    h0 = x @ w1 + b1
    h = jnp.maximum(jnp.maximum(h0 @ w2 + b2, 0) @ w3 + b3, 0) + h0
    h = jnp.maximum(jnp.maximum(h @ w4 + b4, 0) @ w5 + b5, 0) + h
    out = h @ w6 + b6
    mu = out[:, :z_dim]
    sigma = jax.nn.softplus(out[:, z_dim:]) + 1e-07
    return mu, sigma


if __name__ == "__main__":
    input_dim, sub_dim, z_dim = 16, 16, 32

    key = jax.random.PRNGKey(0)
    k_trunk, k_y, k_params = jax.random.split(key, 3)
    params = init_params(k_params, input_dim, sub_dim, z_dim)

    # --- small-batch check, f32 MXU operands (tight tolerance) ---
    batch = 8
    trunk_z = jax.random.normal(k_trunk, (batch, input_dim), jnp.float32)
    y = jax.random.normal(k_y, (batch, sub_dim), jnp.float32)

    mu, sigma = bias_sub_graph_encoder(trunk_z, y, params, z_dim,
                                       mxu_dtype=jnp.float32)
    jax.block_until_ready((mu, sigma))
    mu_ref, sigma_ref = _reference(trunk_z, y, params, z_dim)
    assert mu.shape == (batch, z_dim) and sigma.shape == (batch, z_dim)
    assert jnp.allclose(mu, mu_ref, atol=1e-5, rtol=1e-5)
    assert jnp.allclose(sigma, sigma_ref, atol=1e-5, rtol=1e-5)

    # --- larger-batch check, bf16 MXU operands (v6e/v7x fast path) ---
    batch = 1024
    trunk_z = jax.random.normal(jax.random.fold_in(k_trunk, 1),
                                (batch, input_dim), jnp.float32)
    y = jax.random.normal(jax.random.fold_in(k_y, 1),
                          (batch, sub_dim), jnp.float32)
    mu, sigma = bias_sub_graph_encoder(trunk_z, y, params, z_dim,
                                       tm=256, mxu_dtype=jnp.bfloat16)
    jax.block_until_ready((mu, sigma))
    mu_ref, sigma_ref = _reference(trunk_z, y, params, z_dim)
    assert mu.shape == (batch, z_dim) and sigma.shape == (batch, z_dim)
    assert jnp.allclose(mu, mu_ref, atol=3e-2, rtol=3e-2)
    assert jnp.allclose(sigma, sigma_ref, atol=3e-2, rtol=3e-2)

    print("KERNEL_OK")
</pallas_src>

<mosaic_0001>
module attributes {stable_mosaic.version = 11 : i64} {
  func.func @_encoder_kernel(%arg0: i32, %arg1: memref<8x16xf32, #tpu.memory_space<vmem>>, %arg2: memref<8x16xf32, #tpu.memory_space<vmem>>, %arg3: memref<16x128xf32, #tpu.memory_space<vmem>>, %arg4: memref<16x128xf32, #tpu.memory_space<vmem>>, %arg5: memref<1x128xf32, #tpu.memory_space<vmem>>, %arg6: memref<128x128xf32, #tpu.memory_space<vmem>>, %arg7: memref<1x128xf32, #tpu.memory_space<vmem>>, %arg8: memref<128x128xf32, #tpu.memory_space<vmem>>, %arg9: memref<1x128xf32, #tpu.memory_space<vmem>>, %arg10: memref<128x128xf32, #tpu.memory_space<vmem>>, %arg11: memref<1x128xf32, #tpu.memory_space<vmem>>, %arg12: memref<128x128xf32, #tpu.memory_space<vmem>>, %arg13: memref<1x128xf32, #tpu.memory_space<vmem>>, %arg14: memref<128x128xf32, #tpu.memory_space<vmem>>, %arg15: memref<1x128xf32, #tpu.memory_space<vmem>>, %arg16: memref<8x128xf32, #tpu.memory_space<vmem>>) attributes {dimension_semantics = [#tpu.dimension_semantics<parallel>], iteration_bounds = array<i64: 1>, scalar_prefetch = 0 : i64, scratch_operands = 0 : i64, tpu.core_type = #tpu.core_type<tc>, window_params = [{transform_indices = @transform_0, window_bounds = array<i64: 8, 16>}, {transform_indices = @transform_1, window_bounds = array<i64: 8, 16>}, {pipeline_mode = #tpu.pipeline_mode<synchronous>, transform_indices = @transform_2, window_bounds = array<i64: 16, 128>}, {pipeline_mode = #tpu.pipeline_mode<synchronous>, transform_indices = @transform_3, window_bounds = array<i64: 16, 128>}, {pipeline_mode = #tpu.pipeline_mode<synchronous>, transform_indices = @transform_4, window_bounds = array<i64: 1, 128>}, {pipeline_mode = #tpu.pipeline_mode<synchronous>, transform_indices = @transform_5, window_bounds = array<i64: 128, 128>}, {pipeline_mode = #tpu.pipeline_mode<synchronous>, transform_indices = @transform_6, window_bounds = array<i64: 1, 128>}, {pipeline_mode = #tpu.pipeline_mode<synchronous>, transform_indices = @transform_7, window_bounds = array<i64: 128, 128>}, {pipeline_mode = #tpu.pipeline_mode<synchronous>, transform_indices = @transform_8, window_bounds = array<i64: 1, 128>}, {pipeline_mode = #tpu.pipeline_mode<synchronous>, transform_indices = @transform_9, window_bounds = array<i64: 128, 128>}, {pipeline_mode = #tpu.pipeline_mode<synchronous>, transform_indices = @transform_10, window_bounds = array<i64: 1, 128>}, {pipeline_mode = #tpu.pipeline_mode<synchronous>, transform_indices = @transform_11, window_bounds = array<i64: 128, 128>}, {pipeline_mode = #tpu.pipeline_mode<synchronous>, transform_indices = @transform_12, window_bounds = array<i64: 1, 128>}, {pipeline_mode = #tpu.pipeline_mode<synchronous>, transform_indices = @transform_13, window_bounds = array<i64: 128, 128>}, {pipeline_mode = #tpu.pipeline_mode<synchronous>, transform_indices = @transform_14, window_bounds = array<i64: 1, 128>}, {transform_indices = @transform_15, window_bounds = array<i64: 8, 128>}]} {
    %c0 = arith.constant 0 : index
    %c0_0 = arith.constant 0 : index
    %0 = vector.load %arg1[%c0, %c0_0] : memref<8x16xf32, #tpu.memory_space<vmem>>, vector<8x16xf32>
    %cst = arith.constant 1.000000e+00 : f32
    %1 = vector.broadcast %cst : f32 to vector<8x16xf32>
    %2 = arith.mulf %0, %1 : vector<8x16xf32>
    %c0_1 = arith.constant 0 : index
    %c0_2 = arith.constant 0 : index
    %3 = vector.load %arg2[%c0_1, %c0_2] : memref<8x16xf32, #tpu.memory_space<vmem>>, vector<8x16xf32>
    %cst_3 = arith.constant 1.000000e+00 : f32
    %4 = vector.broadcast %cst_3 : f32 to vector<8x16xf32>
    %5 = arith.mulf %3, %4 : vector<8x16xf32>
    %c0_4 = arith.constant 0 : index
    %c0_5 = arith.constant 0 : index
    %6 = vector.load %arg3[%c0_4, %c0_5] : memref<16x128xf32, #tpu.memory_space<vmem>>, vector<16x128xf32>
    %cst_6 = arith.constant dense<0.000000e+00> : vector<8x128xf32>
    %7 = tpu.matmul %2, %6, %cst_6 {dimension_numbers = #tpu.dot_dimension_numbers<[1], [0], [0], [1], [0, 0, 1, 1], [], []>} : vector<8x16xf32>, vector<16x128xf32>, vector<8x128xf32> -> vector<8x128xf32>
    %c0_7 = arith.constant 0 : index
    %c0_8 = arith.constant 0 : index
    %8 = vector.load %arg4[%c0_7, %c0_8] : memref<16x128xf32, #tpu.memory_space<vmem>>, vector<16x128xf32>
    %cst_9 = arith.constant dense<0.000000e+00> : vector<8x128xf32>
    %9 = tpu.matmul %5, %8, %cst_9 {dimension_numbers = #tpu.dot_dimension_numbers<[1], [0], [0], [1], [0, 0, 1, 1], [], []>} : vector<8x16xf32>, vector<16x128xf32>, vector<8x128xf32> -> vector<8x128xf32>
    %10 = arith.addf %7, %9 : vector<8x128xf32>
    %c0_10 = arith.constant 0 : index
    %c0_11 = arith.constant 0 : index
    %11 = vector.load %arg5[%c0_10, %c0_11] : memref<1x128xf32, #tpu.memory_space<vmem>>, vector<1x128xf32>
    %12 = vector.broadcast %11 : vector<1x128xf32> to vector<8x128xf32>
    %13 = arith.addf %10, %12 : vector<8x128xf32>
    %c0_12 = arith.constant 0 : index
    %c0_13 = arith.constant 0 : index
    %14 = vector.load %arg6[%c0_12, %c0_13] : memref<128x128xf32, #tpu.memory_space<vmem>>, vector<128x128xf32>
    %cst_14 = arith.constant dense<0.000000e+00> : vector<8x128xf32>
    %15 = tpu.matmul %13, %14, %cst_14 {dimension_numbers = #tpu.dot_dimension_numbers<[1], [0], [0], [1], [0, 0, 1, 1], [], []>} : vector<8x128xf32>, vector<128x128xf32>, vector<8x128xf32> -> vector<8x128xf32>
    %c0_15 = arith.constant 0 : index
    %c0_16 = arith.constant 0 : index
    %16 = vector.load %arg7[%c0_15, %c0_16] : memref<1x128xf32, #tpu.memory_space<vmem>>, vector<1x128xf32>
    %17 = vector.broadcast %16 : vector<1x128xf32> to vector<8x128xf32>
    %18 = arith.addf %15, %17 : vector<8x128xf32>
    %cst_17 = arith.constant 0.000000e+00 : f32
    %19 = vector.broadcast %cst_17 : f32 to vector<8x128xf32>
    %20 = arith.maximumf %18, %19 : vector<8x128xf32>
    %c0_18 = arith.constant 0 : index
    %c0_19 = arith.constant 0 : index
    %21 = vector.load %arg8[%c0_18, %c0_19] : memref<128x128xf32, #tpu.memory_space<vmem>>, vector<128x128xf32>
    %cst_20 = arith.constant dense<0.000000e+00> : vector<8x128xf32>
    %22 = tpu.matmul %20, %21, %cst_20 {dimension_numbers = #tpu.dot_dimension_numbers<[1], [0], [0], [1], [0, 0, 1, 1], [], []>} : vector<8x128xf32>, vector<128x128xf32>, vector<8x128xf32> -> vector<8x128xf32>
    %c0_21 = arith.constant 0 : index
    %c0_22 = arith.constant 0 : index
    %23 = vector.load %arg9[%c0_21, %c0_22] : memref<1x128xf32, #tpu.memory_space<vmem>>, vector<1x128xf32>
    %24 = vector.broadcast %23 : vector<1x128xf32> to vector<8x128xf32>
    %25 = arith.addf %22, %24 : vector<8x128xf32>
    %cst_23 = arith.constant 0.000000e+00 : f32
    %26 = vector.broadcast %cst_23 : f32 to vector<8x128xf32>
    %27 = arith.maximumf %25, %26 : vector<8x128xf32>
    %28 = arith.addf %27, %13 : vector<8x128xf32>
    %c0_24 = arith.constant 0 : index
    %c0_25 = arith.constant 0 : index
    %29 = vector.load %arg10[%c0_24, %c0_25] : memref<128x128xf32, #tpu.memory_space<vmem>>, vector<128x128xf32>
    %cst_26 = arith.constant dense<0.000000e+00> : vector<8x128xf32>
    %30 = tpu.matmul %28, %29, %cst_26 {dimension_numbers = #tpu.dot_dimension_numbers<[1], [0], [0], [1], [0, 0, 1, 1], [], []>} : vector<8x128xf32>, vector<128x128xf32>, vector<8x128xf32> -> vector<8x128xf32>
    %c0_27 = arith.constant 0 : index
    %c0_28 = arith.constant 0 : index
    %31 = vector.load %arg11[%c0_27, %c0_28] : memref<1x128xf32, #tpu.memory_space<vmem>>, vector<1x128xf32>
    %32 = vector.broadcast %31 : vector<1x128xf32> to vector<8x128xf32>
    %33 = arith.addf %30, %32 : vector<8x128xf32>
    %cst_29 = arith.constant 0.000000e+00 : f32
    %34 = vector.broadcast %cst_29 : f32 to vector<8x128xf32>
    %35 = arith.maximumf %33, %34 : vector<8x128xf32>
    %c0_30 = arith.constant 0 : index
    %c0_31 = arith.constant 0 : index
    %36 = vector.load %arg12[%c0_30, %c0_31] : memref<128x128xf32, #tpu.memory_space<vmem>>, vector<128x128xf32>
    %cst_32 = arith.constant dense<0.000000e+00> : vector<8x128xf32>
    %37 = tpu.matmul %35, %36, %cst_32 {dimension_numbers = #tpu.dot_dimension_numbers<[1], [0], [0], [1], [0, 0, 1, 1], [], []>} : vector<8x128xf32>, vector<128x128xf32>, vector<8x128xf32> -> vector<8x128xf32>
    %c0_33 = arith.constant 0 : index
    %c0_34 = arith.constant 0 : index
    %38 = vector.load %arg13[%c0_33, %c0_34] : memref<1x128xf32, #tpu.memory_space<vmem>>, vector<1x128xf32>
    %39 = vector.broadcast %38 : vector<1x128xf32> to vector<8x128xf32>
    %40 = arith.addf %37, %39 : vector<8x128xf32>
    %cst_35 = arith.constant 0.000000e+00 : f32
    %41 = vector.broadcast %cst_35 : f32 to vector<8x128xf32>
    %42 = arith.maximumf %40, %41 : vector<8x128xf32>
    %43 = arith.addf %42, %28 : vector<8x128xf32>
    %c0_36 = arith.constant 0 : index
    %c0_37 = arith.constant 0 : index
    %44 = vector.load %arg14[%c0_36, %c0_37] : memref<128x128xf32, #tpu.memory_space<vmem>>, vector<128x128xf32>
    %cst_38 = arith.constant dense<0.000000e+00> : vector<8x128xf32>
    %45 = tpu.matmul %43, %44, %cst_38 {dimension_numbers = #tpu.dot_dimension_numbers<[1], [0], [0], [1], [0, 0, 1, 1], [], []>} : vector<8x128xf32>, vector<128x128xf32>, vector<8x128xf32> -> vector<8x128xf32>
    %c0_39 = arith.constant 0 : index
    %c0_40 = arith.constant 0 : index
    %46 = vector.load %arg15[%c0_39, %c0_40] : memref<1x128xf32, #tpu.memory_space<vmem>>, vector<1x128xf32>
    %47 = vector.broadcast %46 : vector<1x128xf32> to vector<8x128xf32>
    %48 = arith.addf %45, %47 : vector<8x128xf32>
    %49 = tpu.iota {dimensions = array<i32: 1>} : vector<8x128xi32>
    %c32_i32 = arith.constant 32 : i32
    %50 = vector.broadcast %c32_i32 : i32 to vector<8x128xi32>
    %51 = arith.cmpi slt, %49, %50 : vector<8x128xi32>
    %cst_41 = arith.constant 0.000000e+00 : f32
    %52 = vector.broadcast %cst_41 : f32 to vector<8x128xf32>
    %53 = arith.maximumf %48, %52 : vector<8x128xf32>
    %54 = math.absf %48 : vector<8x128xf32>
    %cst_42 = arith.constant 0.000000e+00 : f32
    %55 = vector.broadcast %cst_42 : f32 to vector<8x128xf32>
    %56 = arith.subf %55, %54 : vector<8x128xf32>
    %57 = math.exp %56 : vector<8x128xf32>
    %58 = math.log1p %57 : vector<8x128xf32>
    %59 = arith.addf %53, %58 : vector<8x128xf32>
    %cst_43 = arith.constant 1.000000e-07 : f32
    %60 = vector.broadcast %cst_43 : f32 to vector<8x128xf32>
    %61 = arith.addf %59, %60 : vector<8x128xf32>
    %62 = arith.select %51, %48, %61 : vector<8x128xi1>, vector<8x128xf32>
    %c0_44 = arith.constant 0 : index
    %c0_45 = arith.constant 0 : index
    %63 = vector.load %arg16[%c0_44, %c0_45] : memref<8x128xf32, #tpu.memory_space<vmem>>, vector<8x128xf32>
    tpu.vector_store %arg16[%c0_44, %c0_45], %62 {strides = array<i32>} : memref<8x128xf32, #tpu.memory_space<vmem>>, vector<8x128xf32>,
    return
  }
  func.func @transform_0(%arg0: i32) -> (i32, i32) {
    %c0_i32 = arith.constant 0 : i32
    %c0_i32_0 = arith.constant 0 : i32
    return %arg0, %c0_i32 : i32, i32
  }
  func.func @transform_1(%arg0: i32) -> (i32, i32) {
    %c0_i32 = arith.constant 0 : i32
    %c0_i32_0 = arith.constant 0 : i32
    return %arg0, %c0_i32 : i32, i32
  }
  func.func @transform_2(%arg0: i32) -> (i32, i32) {
    %c0_i32 = arith.constant 0 : i32
    %c0_i32_0 = arith.constant 0 : i32
    %c0_i32_1 = arith.constant 0 : i32
    return %c0_i32, %c0_i32_0 : i32, i32
  }
  func.func @transform_3(%arg0: i32) -> (i32, i32) {
    %c0_i32 = arith.constant 0 : i32
    %c0_i32_0 = arith.constant 0 : i32
    %c0_i32_1 = arith.constant 0 : i32
    return %c0_i32, %c0_i32_0 : i32, i32
  }
  func.func @transform_4(%arg0: i32) -> (i32, i32) {
    %c0_i32 = arith.constant 0 : i32
    %c0_i32_0 = arith.constant 0 : i32
    %c0_i32_1 = arith.constant 0 : i32
    return %c0_i32, %c0_i32_0 : i32, i32
  }
  func.func @transform_5(%arg0: i32) -> (i32, i32) {
    %c0_i32 = arith.constant 0 : i32
    %c0_i32_0 = arith.constant 0 : i32
    %c0_i32_1 = arith.constant 0 : i32
    return %c0_i32, %c0_i32_0 : i32, i32
  }
  func.func @transform_6(%arg0: i32) -> (i32, i32) {
    %c0_i32 = arith.constant 0 : i32
    %c0_i32_0 = arith.constant 0 : i32
    %c0_i32_1 = arith.constant 0 : i32
    return %c0_i32, %c0_i32_0 : i32, i32
  }
  func.func @transform_7(%arg0: i32) -> (i32, i32) {
    %c0_i32 = arith.constant 0 : i32
    %c0_i32_0 = arith.constant 0 : i32
    %c0_i32_1 = arith.constant 0 : i32
    return %c0_i32, %c0_i32_0 : i32, i32
  }
  func.func @transform_8(%arg0: i32) -> (i32, i32) {
    %c0_i32 = arith.constant 0 : i32
    %c0_i32_0 = arith.constant 0 : i32
    %c0_i32_1 = arith.constant 0 : i32
    return %c0_i32, %c0_i32_0 : i32, i32
  }
  func.func @transform_9(%arg0: i32) -> (i32, i32) {
    %c0_i32 = arith.constant 0 : i32
    %c0_i32_0 = arith.constant 0 : i32
    %c0_i32_1 = arith.constant 0 : i32
    return %c0_i32, %c0_i32_0 : i32, i32
  }
  func.func @transform_10(%arg0: i32) -> (i32, i32) {
    %c0_i32 = arith.constant 0 : i32
    %c0_i32_0 = arith.constant 0 : i32
    %c0_i32_1 = arith.constant 0 : i32
    return %c0_i32, %c0_i32_0 : i32, i32
  }
  func.func @transform_11(%arg0: i32) -> (i32, i32) {
    %c0_i32 = arith.constant 0 : i32
    %c0_i32_0 = arith.constant 0 : i32
    %c0_i32_1 = arith.constant 0 : i32
    return %c0_i32, %c0_i32_0 : i32, i32
  }
  func.func @transform_12(%arg0: i32) -> (i32, i32) {
    %c0_i32 = arith.constant 0 : i32
    %c0_i32_0 = arith.constant 0 : i32
    %c0_i32_1 = arith.constant 0 : i32
    return %c0_i32, %c0_i32_0 : i32, i32
  }
  func.func @transform_13(%arg0: i32) -> (i32, i32) {
    %c0_i32 = arith.constant 0 : i32
    %c0_i32_0 = arith.constant 0 : i32
    %c0_i32_1 = arith.constant 0 : i32
    return %c0_i32, %c0_i32_0 : i32, i32
  }
  func.func @transform_14(%arg0: i32) -> (i32, i32) {
    %c0_i32 = arith.constant 0 : i32
    %c0_i32_0 = arith.constant 0 : i32
    %c0_i32_1 = arith.constant 0 : i32
    return %c0_i32, %c0_i32_0 : i32, i32
  }
  func.func @transform_15(%arg0: i32) -> (i32, i32) {
    %c0_i32 = arith.constant 0 : i32
    %c0_i32_0 = arith.constant 0 : i32
    return %arg0, %c0_i32 : i32, i32
  }
}

</mosaic_0001>

<bundles_post_ra>
// kernel: tpu_custom_call.1
= control target key start
LH: loop header
LB: loop body
LE: loop exit
PB: predicated region body
PF: predicated region fallthrough
CT: control target
= control target key end

     0   :  { %20 = vsyncpa [#allocation3], 0  ;;  %s1630_s0 = inlined_call_operand.hbm [shape: f32[8,16], index: 0, kind: input, shape index: {}]   ;;  %s1631_s1 = inlined_call_operand.hbm [shape: f32[8,16], index: 1, kind: input, shape index: {}]   ;;  %s1632_s2 = inlined_call_operand.hbm [shape: f32[16,128], index: 2, kind: input, shape index: {}]   ;;  %s1633_s3 = inlined_call_operand.hbm [shape: f32[16,128], index: 3, kind: input, shape index: {}]   ;;  %s1634_s4 = inlined_call_operand.vmem [shape: f32[1,128], index: 4, kind: input, shape index: {}]   ;;  %s1635_s5 = inlined_call_operand.hbm [shape: f32[128,128], index: 5, kind: input, shape index: {}]   ;;  %s1636_s6 = inlined_call_operand.vmem [shape: f32[1,128], index: 6, kind: input, shape index: {}]   ;;  %s1637_s7 = inlined_call_operand.hbm [shape: f32[128,128], index: 7, kind: input, shape index: {}]   ;;  %s1638_s8 = inlined_call_operand.vmem [shape: f32[1,128], index: 8, kind: input, shape index: {}]   ;;  %s1639_s9 = inlined_call_operand.hbm [shape: f32[128,128], index: 9, kind: input, shape index: {}]   ;;  %s1640_s10 = inlined_call_operand.vmem [shape: f32[1,128], index: 10, kind: input, shape index: {}]   ;;  %s1641_s11 = inlined_call_operand.hbm [shape: f32[128,128], index: 11, kind: input, shape index: {}]   ;;  %s1642_s12 = inlined_call_operand.vmem [shape: f32[1,128], index: 12, kind: input, shape index: {}]   ;;  %s1643_s13 = inlined_call_operand.hbm [shape: f32[128,128], index: 13, kind: input, shape index: {}]   ;;  %s1644_s14 = inlined_call_operand.vmem [shape: f32[1,128], index: 14, kind: input, shape index: {}]   ;;  %s1645_s15 = inlined_call_operand.hbm [shape: f32[8,128], index: 15, kind: output, shape index: {}]  }
   0x1   :  { %21 = vsyncpa [#allocation6], 0 }
   0x2   :  { %22 = vsyncpa [#allocation9], 0 }
   0x3   :  { %23 = vsyncpa [#allocation12], 0 }
   0x4   :  { %24 = vsyncpa [#allocation15], 0 }
   0x5   :  { %25 = vsyncpa [#allocation4], 0  ;;  %s1359_s18 = smov [#allocation5]  }
   0x6   :  { %s42_s19 = sshll.u32 %s1359_s18, 4  ;;  %s43_s19 = int_to_ptr.vmem [resolvable:$true] %s42_s19 }
   0x7   :  { %s1155_s20 = scalar_lea.vmem %s43_s19, 128  ;;  %p1160_p1 = scmp.lt.s32.totalorder %s43_s19, %s43_s19 }
   0x8   :  { %p1156_p0 = scmp.ne.s32.totalorder %s43_s19, %s1155_s20  ;;  %p1161_p2 = scmp.lt.s32.totalorder %s1155_s20, %s1155_s20 }
   0xa   :  { %p1162_p3 = por %p1161_p2, %p1160_p1 }
   0xc   :  { %p1163_p4 = pnand %p1162_p3, %p1156_p0 }
   0xe   :  { %1166 = shalt.err (!%p1163_p4)
}
   0xf   :  { %45 = dma.hbm_to_vmem [thread:$0]  %s1631_s1, 128, %s43_s19, [#allocation6]  }
  0x10   :  { %s1360_s23 = smov [#allocation8]   ;;  %s1361_s25 = smov [#allocation11]  }
  0x11   :  { %s63_s24 = sshll.u32 %s1360_s23, 4  ;;  %s91_s26 = sshll.u32 %s1361_s25, 4  ;;  %s64_s24 = int_to_ptr.vmem [resolvable:$true] %s63_s24  ;;  %s92_s26 = int_to_ptr.vmem [resolvable:$true] %s91_s26 }
  0x12   :  { %s1175_s27 = scalar_lea.vmem %s64_s24, 256  ;;  %p1180_p6 = scmp.lt.s32.totalorder %s64_s24, %s64_s24 }
  0x13   :  { %p1176_p5 = scmp.ne.s32.totalorder %s64_s24, %s1175_s27  ;;  %p1181_p7 = scmp.lt.s32.totalorder %s1175_s27, %s1175_s27 }
  0x15   :  { %p1182_p8 = por %p1181_p7, %p1180_p6 }
  0x17   :  { %p1183_p9 = pnand %p1182_p8, %p1176_p5 }
  0x19   :  { %1186 = shalt.err (!%p1183_p9)
}
  0x1a   :  { %s1362_s28 = smov 128   ;;  %s1363_s29 = smov 8  }
  0x1b   :  { %69 = dma.hbm_to_vmem [thread:$0]  %s1633_s3, 256, %s64_s24, [#allocation9], %s1362_s28, %s1362_s28, %s1363_s29  }
  0x1c   :  { %s1195_s1 = scalar_lea.vmem %s92_s26, 2048  ;;  %p1200_p11 = scmp.lt.s32.totalorder %s92_s26, %s92_s26 }
  0x1d   :  { %p1196_p10 = scmp.ne.s32.totalorder %s92_s26, %s1195_s1  ;;  %p1201_p12 = scmp.lt.s32.totalorder %s1195_s1, %s1195_s1 }
  0x1f   :  { %p1202_p13 = por %p1201_p12, %p1200_p11 }
  0x21   :  { %p1203_p0 = pnand %p1202_p13, %p1196_p10 }
  0x23   :  { %1206 = shalt.err (!%p1203_p0)
}
  0x24   :  { %97 = dma.hbm_to_vmem [thread:$0]  %s1637_s7, 2048, %s92_s26, [#allocation12], %s1362_s28, %s1362_s28, %s1363_s29  }
  0x25   :  { %s1364_s19 = smov [#allocation14]   ;;  %s1365_s21 = smov [#allocation2]  }
  0x26   :  { %s119_s20 = sshll.u32 %s1364_s19, 4  ;;  %s32_s3 = sshll.u32 %s1365_s21, 4  ;;  %s120_s20 = int_to_ptr.vmem [resolvable:$true] %s119_s20  ;;  %s33_s3 = int_to_ptr.vmem [resolvable:$true] %s32_s3 }
  0x27   :  { %s1215_s22 = scalar_lea.vmem %s120_s20, 2048  ;;  %p1220_p2 = scmp.lt.s32.totalorder %s120_s20, %s120_s20 }
  0x28   :  { %p1216_p1 = scmp.ne.s32.totalorder %s120_s20, %s1215_s22  ;;  %p1221_p3 = scmp.lt.s32.totalorder %s1215_s22, %s1215_s22 }
  0x2a   :  { %p1222_p4 = por %p1221_p3, %p1220_p2 }
  0x2c   :  { %p1223_p5 = pnand %p1222_p4, %p1216_p1 }
  0x2e   :  { %1226 = shalt.err (!%p1223_p5)
}
  0x2f   :  { %125 = dma.hbm_to_vmem [thread:$0]  %s1641_s11, 2048, %s120_s20, [#allocation15], %s1362_s28, %s1362_s28, %s1363_s29  }
  0x30   :  { %s1235_s7 = scalar_lea.vmem %s33_s3, 128  ;;  %p1240_p7 = scmp.lt.s32.totalorder %s33_s3, %s33_s3 }
  0x31   :  { %p1236_p6 = scmp.ne.s32.totalorder %s33_s3, %s1235_s7  ;;  %p1241_p8 = scmp.lt.s32.totalorder %s1235_s7, %s1235_s7 }
  0x33   :  { %p1242_p9 = por %p1241_p8, %p1240_p7 }
  0x35   :  { %p1243_p10 = pnand %p1242_p9, %p1236_p6 }
  0x37   :  { %1246 = shalt.err (!%p1243_p10)
}
  0x38   :  { %35 = dma.hbm_to_vmem [thread:$0]  %s1630_s0, 128, %s33_s3, [#allocation3]  }
  0x39   :  { %s1366_s27 = smov [#allocation7]   ;;  %s1367_s16 = smov [#allocation10]  }
  0x3a   :  { %s51_s30 = sshll.u32 %s1366_s27, 4  ;;  %s77_s1 = sshll.u32 %s1367_s16, 4  ;;  %s52_s30 = int_to_ptr.vmem [resolvable:$true] %s51_s30  ;;  %s78_s1 = int_to_ptr.vmem [resolvable:$true] %s77_s1 }
  0x3b   :  { %s1255_s17 = scalar_lea.vmem %s52_s30, 256  ;;  %p1260_p12 = scmp.lt.s32.totalorder %s52_s30, %s52_s30 }
  0x3c   :  { %p1256_p11 = scmp.ne.s32.totalorder %s52_s30, %s1255_s17  ;;  %p1261_p13 = scmp.lt.s32.totalorder %s1255_s17, %s1255_s17 }
  0x3e   :  { %p1262_p0 = por %p1261_p13, %p1260_p12 }
  0x40   :  { %p1263_p1 = pnand %p1262_p0, %p1256_p11 }
  0x42   :  { %1266 = shalt.err (!%p1263_p1)
}
  0x43   :  { %57 = dma.hbm_to_vmem [thread:$0]  %s1632_s2, 256, %s52_s30, [#allocation6], %s1362_s28, %s1362_s28, %s1363_s29  }
  0x44   :  { %s1275_s0 = scalar_lea.vmem %s78_s1, 2048  ;;  %p1280_p3 = scmp.lt.s32.totalorder %s78_s1, %s78_s1 }
  0x45   :  { %p1276_p2 = scmp.ne.s32.totalorder %s78_s1, %s1275_s0  ;;  %p1281_p4 = scmp.lt.s32.totalorder %s1275_s0, %s1275_s0 }
  0x47   :  { %p1282_p5 = por %p1281_p4, %p1280_p3 }
  0x49   :  { %p1283_p6 = pnand %p1282_p5, %p1276_p2 }
  0x4b   :  { %1286 = shalt.err (!%p1283_p6)
}
  0x4c   :  { %83 = dma.hbm_to_vmem [thread:$0]  %s1635_s5, 2048, %s78_s1, [#allocation9], %s1362_s28, %s1362_s28, %s1363_s29  }
  0x4d   :  { %s1368_s21 = smov [#allocation13]   ;;  %s1369_s22 = smov [#allocation16]  }
  0x4e   :  { %s105_s3 = sshll.u32 %s1368_s21, 4  ;;  %s133_s2 = sshll.u32 %s1369_s22, 4  ;;  %s106_s3 = int_to_ptr.vmem [resolvable:$true] %s105_s3  ;;  %s134_s2 = int_to_ptr.vmem [resolvable:$true] %s133_s2 }
  0x4f   :  { %s1295_s23 = scalar_lea.vmem %s106_s3, 2048  ;;  %p1300_p8 = scmp.lt.s32.totalorder %s106_s3, %s106_s3 }
  0x50   :  { %p1296_p7 = scmp.ne.s32.totalorder %s106_s3, %s1295_s23  ;;  %p1301_p9 = scmp.lt.s32.totalorder %s1295_s23, %s1295_s23 }
  0x52   :  { %p1302_p10 = por %p1301_p9, %p1300_p8 }
  0x54   :  { %p1303_p11 = pnand %p1302_p10, %p1296_p7 }
  0x56   :  { %1306 = shalt.err (!%p1303_p11)
}
  0x57   :  { %111 = dma.hbm_to_vmem [thread:$0]  %s1639_s9, 2048, %s106_s3, [#allocation12], %s1362_s28, %s1362_s28, %s1363_s29  }
  0x58   :  { %s1315_s5 = scalar_lea.vmem %s134_s2, 2048  ;;  %p1320_p13 = scmp.lt.s32.totalorder %s134_s2, %s134_s2 }
  0x59   :  { %p1316_p12 = scmp.ne.s32.totalorder %s134_s2, %s1315_s5  ;;  %p1321_p0 = scmp.lt.s32.totalorder %s1315_s5, %s1315_s5 }
  0x5b   :  { %p1322_p1 = por %p1321_p0, %p1320_p13 }
  0x5d   :  { %p1323_p2 = pnand %p1322_p1, %p1316_p12 }
  0x5f   :  { %1326 = shalt.err (!%p1323_p2)
}
  0x60   :  { %139 = dma.hbm_to_vmem [thread:$0]  %s1643_s13, 2048, %s134_s2, [#allocation15], %s1362_s28, %s1362_s28, %s1363_s29  }
  0x61   :  { %1347 = dma.done.wait [#allocation3], 128  }
  0x62   :  { %1348 = vsyncadd [#allocation3], 4294967168 }
  0x63   :  { %1349 = dma.done.wait [#allocation6], 384  }
  0x64   :  { %1350 = vsyncadd [#allocation6], 4294966912 }
  0x65   :  { %1351 = dma.done.wait [#allocation9], 2304  }
  0x66   :  { %1352 = vsyncadd [#allocation9], 4294964992 }
  0x67   :  { %1353 = dma.done.wait [#allocation12], 4096  }
  0x68   :  { %1354 = vsyncadd [#allocation12], 4294963200 }
  0x69   :  { %1355 = dma.done.wait [#allocation15], 4096  }
  0x6a   :  { %1356 = vsyncadd [#allocation15], 4294963200  ;;  %v1370_v0 = vmov 0.0   ;;  %vm1371_vm0 = vmmov 0   ;;  %v174_v1 = vld [vmem:[#allocation8 + $0x8] sm:$0xff]  ;;  %v173_v2 = vld [vmem:[#allocation8] sm:$0xff] }
  0x6b   :  { %940 = vmatprep.subr.mxu1 %v1370_v0  ;;  %944 = vmatprep.mubr.msk.f32.mxu1 %vm1371_vm0, %v1370_v0  ;;  %v170_v3 = vld [vmem:[#allocation5] sm:$0xff]  ;;  %vm175_vm1 = vcmask 130048   ;;  %v172_v4 = vld [vmem:[#allocation7 + $0x8] sm:$0xff]  ;;  %v171_v6 = vld [vmem:[#allocation7] sm:$0xff] }
  0x6c   :  { %954 = vmatprep.subr.mxu0 %v1370_v0  ;;  %986 = vmatprep.mubr.msk.f32.mxu0 %vm1371_vm0, %v1370_v0  ;;  %v345_v5 = vld [vmem:[#allocation10 + $0x78] sm:$0xff]  ;;  %v344_v7 = vld [vmem:[#allocation10 + $0x70] sm:$0xff]  ;;  %v343_v9 = vld [vmem:[#allocation10 + $0x68] sm:$0xff] }
  0x6d   :  { %941 = vmatpush3.msra.mxu1 %v174_v1  ;;  %955 = vmatpush3.msra.mxu0 %v345_v5  ;;  %v169_v8 = vld [vmem:[#allocation2] sm:$0xff]  ;;  %v342_v10 = vld [vmem:[#allocation10 + $0x60] sm:$0xff]  ;;  %v341_v11 = vld [vmem:[#allocation10 + $0x58] sm:$0xff] }
  0x6e   :  { %942 = vmatprep.subr.mxu1 %v1370_v0  ;;  %956 = vmatprep.subr.mxu0 %v1370_v0  ;;  %v340_v12 = vld [vmem:[#allocation10 + $0x50] sm:$0xff]  ;;  %v339_v13 = vld [vmem:[#allocation10 + $0x48] sm:$0xff]  ;;  %v338_v14 = vld [vmem:[#allocation10 + $0x40] sm:$0xff] }
  0x6f   :  { %943 = vmatpush3.msra.mxu1 %v173_v2  ;;  %957 = vmatpush3.msra.mxu0 %v344_v7  ;;  %v337_v15 = vld [vmem:[#allocation10 + $0x38] sm:$0xff]  ;;  %v336_v16 = vld [vmem:[#allocation10 + $0x30] sm:$0xff]  ;;  %v335_v17 = vld [vmem:[#allocation10 + $0x28] sm:$0xff] }
  0x70   :  { %945 = vmatmul.mubr.msk.f32.vlgmr.msra.gmra.mxu1 %vm175_vm1, %v170_v3  ;;  %947 = vmatprep.subr.mxu1 %v1370_v0  ;;  %v334_v18 = vld [vmem:[#allocation10 + $0x20] sm:$0xff]  ;;  %v333_v19 = vld [vmem:[#allocation10 + $0x18] sm:$0xff]  ;;  %v332_v20 = vld [vmem:[#allocation10 + $0x10] sm:$0xff] }
  0x71   :  { %948 = vmatpush3.msra.mxu1 %v172_v4  ;;  %951 = vmatprep.mubr.msk.f32.mxu1 %vm1371_vm0, %v1370_v0  ;;  %v331_v21 = vld [vmem:[#allocation10 + $0x8] sm:$0xff]  ;;  %v330_v22 = vld [vmem:[#allocation10] sm:$0xff]  ;;  %v439_v23 = vld [vmem:[#allocation11 + $0x78] sm:$0xff] }
  0x72   :  { %949 = vmatprep.subr.mxu1 %v1370_v0  ;;  %958 = vmatprep.subr.mxu0 %v1370_v0  ;;  %v438_v24 = vld [vmem:[#allocation11 + $0x70] sm:$0xff]  ;;  %v437_v25 = vld [vmem:[#allocation11 + $0x68] sm:$0xff]  ;;  %v436_v26 = vld [vmem:[#allocation11 + $0x60] sm:$0xff] }
  0x73   :  { %950 = vmatpush3.msra.mxu1 %v171_v6  ;;  %959 = vmatpush3.msra.mxu0 %v343_v9  ;;  %v435_v27 = vld [vmem:[#allocation11 + $0x58] sm:$0xff]  ;;  %v434_v28 = vld [vmem:[#allocation11 + $0x50] sm:$0xff]  ;;  %v433_v29 = vld [vmem:[#allocation11 + $0x48] sm:$0xff] }
  0x74   :  { %952 = vmatmul.mubr.msk.f32.vlgmr.msra.gmra.mxu1 %vm175_vm1, %v169_v8  ;;  %989 = vmatprep.subr.mxu1 %v1370_v0  ;;  %v432_v30 = vld [vmem:[#allocation11 + $0x40] sm:$0xff]  ;;  %v431_v31 = vld [vmem:[#allocation11 + $0x38] sm:$0xff]  ;;  %v430_v32 = vld [vmem:[#allocation11 + $0x30] sm:$0xff] }
  0x75   :  { %960 = vmatprep.subr.mxu0 %v1370_v0  ;;  %1021 = vmatprep.mubr.msk.f32.mxu1 %vm1371_vm0, %v1370_v0  ;;  %v429_v33 = vld [vmem:[#allocation11 + $0x28] sm:$0xff]  ;;  %v428_v34 = vld [vmem:[#allocation11 + $0x20] sm:$0xff]  ;;  %v427_v35 = vld [vmem:[#allocation11 + $0x18] sm:$0xff] }
  0x76   :  { %961 = vmatpush3.msra.mxu0 %v342_v10  ;;  %990 = vmatpush3.msra.mxu1 %v439_v23  ;;  %v843_v39 = vld [vmem:[%s1634_s4] ss:$0 sm:$0xff]  ;;  %v425_v44 = vld [vmem:[#allocation11 + $0x8] sm:$0xff]  ;;  %v424_v45 = vld [vmem:[#allocation11] sm:$0xff] }
  0x77   :  { %962 = vmatprep.subr.mxu0 %v1370_v0  ;;  %991 = vmatprep.subr.mxu1 %v1370_v0  ;;  %v426_v43 = vld [vmem:[#allocation11 + $0x10] sm:$0xff]  ;;  %v534_v46 = vld [vmem:[#allocation13 + $0x78] sm:$0xff]  ;;  %v532_v48 = vld [vmem:[#allocation13 + $0x68] sm:$0xff] }
  0x78   :  { %963 = vmatpush3.msra.mxu0 %v341_v11  ;;  %992 = vmatpush3.msra.mxu1 %v438_v24  ;;  %v533_v47 = vld [vmem:[#allocation13 + $0x70] sm:$0xff]  ;;  %v531_v49 = vld [vmem:[#allocation13 + $0x60] sm:$0xff]  ;;  %v530_v50 = vld [vmem:[#allocation13 + $0x58] sm:$0xff] }
  0x79   :  { %964 = vmatprep.subr.mxu0 %v1370_v0  ;;  %993 = vmatprep.subr.mxu1 %v1370_v0  ;;  %v529_v51 = vld [vmem:[#allocation13 + $0x50] sm:$0xff]  ;;  %v528_v52 = vld [vmem:[#allocation13 + $0x48] sm:$0xff]  ;;  %v527_v53 = vld [vmem:[#allocation13 + $0x40] sm:$0xff] }
  0x7a   :  { %965 = vmatpush3.msra.mxu0 %v340_v12  ;;  %994 = vmatpush3.msra.mxu1 %v437_v25  ;;  %v526_v54 = vld [vmem:[#allocation13 + $0x38] sm:$0xff]  ;;  %v525_v55 = vld [vmem:[#allocation13 + $0x30] sm:$0xff]  ;;  %v524_v56 = vld [vmem:[#allocation13 + $0x28] sm:$0xff] }
  0x7b   :  { %966 = vmatprep.subr.mxu0 %v1370_v0  ;;  %995 = vmatprep.subr.mxu1 %v1370_v0  ;;  %v523_v57 = vld [vmem:[#allocation13 + $0x20] sm:$0xff]  ;;  %v844_v58 = vld [vmem:[%s1636_s6] ss:$0 sm:$0xff]  ;;  %v522_v63 = vld [vmem:[#allocation13 + $0x18] sm:$0xff] }
  0x7c   :  { %967 = vmatpush3.msra.mxu0 %v339_v13  ;;  %996 = vmatpush3.msra.mxu1 %v436_v26  ;;  %v521_v1 = vld [vmem:[#allocation13 + $0x10] sm:$0xff]  ;;  %v520_v2 = vld [vmem:[#allocation13 + $0x8] sm:$0xff]  ;;  %v519_v3 = vld [vmem:[#allocation13] sm:$0xff] }
  0x7d   :  { %968 = vmatprep.subr.mxu0 %v1370_v0  ;;  %997 = vmatprep.subr.mxu1 %v1370_v0  ;;  %v628_v4 = vld [vmem:[#allocation14 + $0x78] sm:$0xff]  ;;  %v627_v5 = vld [vmem:[#allocation14 + $0x70] sm:$0xff]  ;;  %v626_v6 = vld [vmem:[#allocation14 + $0x68] sm:$0xff] }
  0x7e   :  { %969 = vmatpush3.msra.mxu0 %v338_v14  ;;  %998 = vmatpush3.msra.mxu1 %v435_v27  ;;  %v625_v7 = vld [vmem:[#allocation14 + $0x60] sm:$0xff]  ;;  %v624_v8 = vld [vmem:[#allocation14 + $0x58] sm:$0xff]  ;;  %v623_v9 = vld [vmem:[#allocation14 + $0x50] sm:$0xff] }
  0x7f   :  { %970 = vmatprep.subr.mxu0 %v1370_v0  ;;  %999 = vmatprep.subr.mxu1 %v1370_v0  ;;  %v622_v10 = vld [vmem:[#allocation14 + $0x48] sm:$0xff]  ;;  %v621_v11 = vld [vmem:[#allocation14 + $0x40] sm:$0xff]  ;;  %v620_v12 = vld [vmem:[#allocation14 + $0x38] sm:$0xff] }
  0x80   :  { %971 = vmatpush3.msra.mxu0 %v337_v15  ;;  %1000 = vmatpush3.msra.mxu1 %v434_v28  ;;  %v619_v13 = vld [vmem:[#allocation14 + $0x30] sm:$0xff]  ;;  %v618_v14 = vld [vmem:[#allocation14 + $0x28] sm:$0xff]  ;;  %v617_v15 = vld [vmem:[#allocation14 + $0x20] sm:$0xff] }
  0x81   :  { %972 = vmatprep.subr.mxu0 %v1370_v0  ;;  %1001 = vmatprep.subr.mxu1 %v1370_v0  ;;  %v615_v23 = vld [vmem:[#allocation14 + $0x10] sm:$0xff]  ;;  %v614_v24 = vld [vmem:[#allocation14 + $0x8] sm:$0xff]  ;;  %v613_v25 = vld [vmem:[#allocation14] sm:$0xff] }
  0x82   :  { %973 = vmatpush3.msra.mxu0 %v336_v16  ;;  %1002 = vmatpush3.msra.mxu1 %v433_v29  ;;  %v616_v16 = vld [vmem:[#allocation14 + $0x18] sm:$0xff]  ;;  %v722_v27 = vld [vmem:[#allocation16 + $0x70] sm:$0xff]  ;;  %v721_v28 = vld [vmem:[#allocation16 + $0x68] sm:$0xff] }
  0x83   :  { %974 = vmatprep.subr.mxu0 %v1370_v0  ;;  %1003 = vmatprep.subr.mxu1 %v1370_v0  ;;  %v723_v26 = vld [vmem:[#allocation16 + $0x78] sm:$0xff]  ;;  %v720_v29 = vld [vmem:[#allocation16 + $0x60] sm:$0xff] }
  0x84   :  { %975 = vmatpush3.msra.mxu0 %v335_v17  ;;  %1004 = vmatpush3.msra.mxu1 %v432_v30  ;;  %v845_v17 = vld [vmem:[%s1638_s8] ss:$0 sm:$0xff]  ;;  %v719_v30 = vld [vmem:[#allocation16 + $0x58] sm:$0xff] }
  0x85   :  { %976 = vmatprep.subr.mxu0 %v1370_v0  ;;  %1005 = vmatprep.subr.mxu1 %v1370_v0 }
  0x86   :  { %977 = vmatpush3.msra.mxu0 %v334_v18  ;;  %1006 = vmatpush3.msra.mxu1 %v431_v31  ;;  %v718_v31 = vld [vmem:[#allocation16 + $0x50] sm:$0xff] }
  0x87   :  { %978 = vmatprep.subr.mxu0 %v1370_v0  ;;  %1007 = vmatprep.subr.mxu1 %v1370_v0 }
  0x88   :  { %979 = vmatpush3.msra.mxu0 %v333_v19  ;;  %1008 = vmatpush3.msra.mxu1 %v430_v32  ;;  %v717_v32 = vld [vmem:[#allocation16 + $0x48] sm:$0xff] }
  0x89   :  { %980 = vmatprep.subr.mxu0 %v1370_v0  ;;  %1009 = vmatprep.subr.mxu1 %v1370_v0 }
  0x8a   :  { %981 = vmatpush3.msra.mxu0 %v332_v20  ;;  %1010 = vmatpush3.msra.mxu1 %v429_v33  ;;  %v716_v33 = vld [vmem:[#allocation16 + $0x40] sm:$0xff] }
  0x8b   :  { %982 = vmatprep.subr.mxu0 %v1370_v0  ;;  %1011 = vmatprep.subr.mxu1 %v1370_v0 }
  0x8c   :  { %983 = vmatpush3.msra.mxu0 %v331_v21  ;;  %1012 = vmatpush3.msra.mxu1 %v428_v34  ;;  %v715_v34 = vld [vmem:[#allocation16 + $0x38] sm:$0xff] }
  0x8d   :  { %984 = vmatprep.subr.mxu0 %v1370_v0  ;;  %1013 = vmatprep.subr.mxu1 %v1370_v0 }
  0x8e   :  { %985 = vmatpush3.msra.mxu0 %v330_v22  ;;  %1014 = vmatpush3.msra.mxu1 %v427_v35  ;;  %v714_v35 = vld [vmem:[#allocation16 + $0x30] sm:$0xff] }
  0x8f   :  { %1024 = vmatprep.subr.mxu0 %v1370_v0  ;;  %1015 = vmatprep.subr.mxu1 %v1370_v0 }
  0x90   :  { %1016 = vmatpush3.msra.mxu1 %v426_v43  ;;  %v711_v43 = vld [vmem:[#allocation16 + $0x18] sm:$0xff] }
  0x91   :  { %1017 = vmatprep.subr.mxu1 %v1370_v0 }
  0x92   :  { %1018 = vmatpush3.msra.mxu1 %v425_v44  ;;  %v710_v44 = vld [vmem:[#allocation16 + $0x10] sm:$0xff] }
  0x93   :  { %1019 = vmatprep.subr.mxu1 %v1370_v0 }
  0x94   :  { %1020 = vmatpush3.msra.mxu1 %v424_v45  ;;  %v709_v45 = vld [vmem:[#allocation16 + $0x8] sm:$0xff] }
  0x95   :  { %1059 = vmatprep.subr.mxu1 %v1370_v0 }
 0x130   :  { %v245_v36 = vpop.f32.mrf.mxu1 }
 0x132   :  { %v946_v37 = vpop.f32.mrf.mxu1 }
 0x133   :  { %v712_v37 = vld [vmem:[#allocation16 + $0x20] sm:$0xff] }
 0x134   :  { %v318_v38 = vpop.f32.mrf.mxu1 }
 0x135   :  { %v319_v40 = vadd.f32 %v318_v38, %v245_v36  ;;  %v713_v36 = vld [vmem:[#allocation16 + $0x28] sm:$0xff]  ;;  %v846_v38 = vld [vmem:[%s1640_s10] ss:$0 sm:$0xff] }
 0x136   :  { %v953_v41 = vpop.f32.mrf.mxu1 }
 0x137   :  { %v1549_v42 = vadd.f32 %v843_v39, %v319_v40 }
 0x139   :  { %987 = vmatmul.mubr.f32.vlgmr.msra.gmra.mxu0 %v1549_v42 }
 0x13a   :  { %1056 = vmatprep.mubr.msk.f32.mxu0 %vm1371_vm0, %v1370_v0  ;;  %1025 = vmatpush3.msra.mxu0 %v534_v46  ;;  %v708_v46 = vld [vmem:[#allocation16] sm:$0xff] }
 0x13b   :  { %1026 = vmatprep.subr.mxu0 %v1370_v0 }
 0x13c   :  { %1027 = vmatpush3.msra.mxu0 %v533_v47  ;;  %v847_v47 = vld [vmem:[%s1642_s12] ss:$0 sm:$0xff]  ;;  %s1372_s12 = smov [#allocation17]  }
 0x13d   :  { %1028 = vmatprep.subr.mxu0 %v1370_v0 }
 0x13e   :  { %1029 = vmatpush3.msra.mxu0 %v532_v48 }
 0x13f   :  { %1030 = vmatprep.subr.mxu0 %v1370_v0 }
 0x140   :  { %1031 = vmatpush3.msra.mxu0 %v531_v49 }
 0x141   :  { %1032 = vmatprep.subr.mxu0 %v1370_v0 }
 0x142   :  { %1033 = vmatpush3.msra.mxu0 %v530_v50 }
 0x143   :  { %1034 = vmatprep.subr.mxu0 %v1370_v0 }
 0x144   :  { %1035 = vmatpush3.msra.mxu0 %v529_v51 }
 0x145   :  { %1036 = vmatprep.subr.mxu0 %v1370_v0 }
 0x146   :  { %1037 = vmatpush3.msra.mxu0 %v528_v52 }
 0x147   :  { %1038 = vmatprep.subr.mxu0 %v1370_v0 }
 0x148   :  { %1039 = vmatpush3.msra.mxu0 %v527_v53  ;;  %v848_v53 = vld [vmem:[%s1644_s14] ss:$0 sm:$0xff]  ;;  %s828_s14 = sshll.u32 %s1372_s12, 4  ;;  %s829_s14 = int_to_ptr.vmem [resolvable:$true] %s828_s14 }
 0x149   :  { %1040 = vmatprep.subr.mxu0 %v1370_v0  ;;  %s1327_s17 = scalar_lea.vmem %s829_s14, 128  ;;  %p1332_p4 = scmp.lt.s32.totalorder %s829_s14, %s829_s14 }
 0x14a   :  { %1041 = vmatpush3.msra.mxu0 %v526_v54  ;;  %p1328_p3 = scmp.ne.s32.totalorder %s829_s14, %s1327_s17  ;;  %p1333_p5 = scmp.lt.s32.totalorder %s1327_s17, %s1327_s17 }
 0x14b   :  { %1042 = vmatprep.subr.mxu0 %v1370_v0 }
 0x14c   :  { %1043 = vmatpush3.msra.mxu0 %v525_v55  ;;  %p1334_p6 = por %p1333_p5, %p1332_p4 }
 0x14d   :  { %1044 = vmatprep.subr.mxu0 %v1370_v0 }
 0x14e   :  { %1045 = vmatpush3.msra.mxu0 %v524_v56  ;;  %p1335_p7 = pnand %p1334_p6, %p1328_p3 }
 0x14f   :  { %1046 = vmatprep.subr.mxu0 %v1370_v0 }
 0x150   :  { %1047 = vmatpush3.msra.mxu0 %v523_v57 }
 0x151   :  { %1048 = vmatprep.subr.mxu0 %v1370_v0 }
 0x152   :  { %1049 = vmatpush3.msra.mxu0 %v522_v63  ;;  %v801_v63 = vlaneseq }
 0x153   :  { %1050 = vmatprep.subr.mxu0 %v1370_v0 }
 0x154   :  { %1051 = vmatpush3.msra.mxu0 %v521_v1 }
 0x155   :  { %1052 = vmatprep.subr.mxu0 %v1370_v0 }
 0x156   :  { %1053 = vmatpush3.msra.mxu0 %v520_v2 }
 0x157   :  { %1054 = vmatprep.subr.mxu0 %v1370_v0 }
 0x158   :  { %1055 = vmatpush3.msra.mxu0 %v519_v3 }
 0x159   :  { %1094 = vmatprep.subr.mxu0 %v1370_v0 }
 0x1f9   :  { %v419_v59 = vpop.f32.mrf.mxu0 }
 0x1fa   :  { %v420_v60 = vadd.f32 %v844_v58, %v419_v59 }
 0x1fb   :  { %v988_v61 = vpop.f32.mrf.mxu0 }
 0x1fc   :  { %v423_v62 = vmax.f32 %v420_v60, 0.0 }
 0x1fe   :  { %1022 = vmatmul.mubr.f32.vlgmr.msra.gmra.mxu1 %v423_v62 }
 0x1ff   :  { %1091 = vmatprep.mubr.msk.f32.mxu1 %vm1371_vm0, %v1370_v0  ;;  %1060 = vmatpush3.msra.mxu1 %v628_v4 }
 0x200   :  { %1061 = vmatprep.subr.mxu1 %v1370_v0 }
 0x201   :  { %1062 = vmatpush3.msra.mxu1 %v627_v5  ;;  %v802_v5 = vand.u32 127, %v801_v63 }
 0x202   :  { %1063 = vmatprep.subr.mxu1 %v1370_v0 }
 0x203   :  { %1064 = vmatpush3.msra.mxu1 %v626_v6  ;;  %vm803_vm3 = vcmp.lt.s32.totalorder %v802_v5, 32 }
 0x204   :  { %1065 = vmatprep.subr.mxu1 %v1370_v0 }
 0x205   :  { %1066 = vmatpush3.msra.mxu1 %v625_v7 }
 0x206   :  { %1067 = vmatprep.subr.mxu1 %v1370_v0 }
 0x207   :  { %1068 = vmatpush3.msra.mxu1 %v624_v8 }
 0x208   :  { %1069 = vmatprep.subr.mxu1 %v1370_v0 }
 0x209   :  { %1070 = vmatpush3.msra.mxu1 %v623_v9 }
 0x20a   :  { %1071 = vmatprep.subr.mxu1 %v1370_v0 }
 0x20b   :  { %1072 = vmatpush3.msra.mxu1 %v622_v10 }
 0x20c   :  { %1073 = vmatprep.subr.mxu1 %v1370_v0 }
 0x20d   :  { %1074 = vmatpush3.msra.mxu1 %v621_v11 }
 0x20e   :  { %1075 = vmatprep.subr.mxu1 %v1370_v0 }
 0x20f   :  { %1076 = vmatpush3.msra.mxu1 %v620_v12 }
 0x210   :  { %1077 = vmatprep.subr.mxu1 %v1370_v0 }
 0x211   :  { %1078 = vmatpush3.msra.mxu1 %v619_v13 }
 0x212   :  { %1079 = vmatprep.subr.mxu1 %v1370_v0 }
 0x213   :  { %1080 = vmatpush3.msra.mxu1 %v618_v14 }
 0x214   :  { %1081 = vmatprep.subr.mxu1 %v1370_v0 }
 0x215   :  { %1082 = vmatpush3.msra.mxu1 %v617_v15 }
 0x216   :  { %1083 = vmatprep.subr.mxu1 %v1370_v0 }
 0x217   :  { %1084 = vmatpush3.msra.mxu1 %v616_v16 }
 0x218   :  { %1085 = vmatprep.subr.mxu1 %v1370_v0 }
 0x219   :  { %1086 = vmatpush3.msra.mxu1 %v615_v23 }
 0x21a   :  { %1087 = vmatprep.subr.mxu1 %v1370_v0 }
 0x21b   :  { %1088 = vmatpush3.msra.mxu1 %v614_v24 }
 0x21c   :  { %1089 = vmatprep.subr.mxu1 %v1370_v0 }
 0x21d   :  { %1090 = vmatpush3.msra.mxu1 %v613_v25 }
 0x2be   :  { %v513_v18 = vpop.f32.mrf.mxu1 }
 0x2bf   :  { %v514_v19 = vadd.f32 %v845_v17, %v513_v18 }
 0x2c0   :  { %v1023_v20 = vpop.f32.mrf.mxu1 }
 0x2c1   :  { %v517_v21 = vmax.f32 %v514_v19, 0.0 }
 0x2c3   :  { %v1595_v22 = vadd.f32 %v517_v21, %v1549_v42 }
 0x2c5   :  { %1057 = vmatmul.mubr.f32.vlgmr.msra.gmra.mxu0 %v1595_v22 }
 0x2c6   :  { %1126 = vmatprep.mubr.msk.f32.mxu0 %vm1371_vm0, %v1370_v0  ;;  %1095 = vmatpush3.msra.mxu0 %v723_v26 }
 0x2c7   :  { %1096 = vmatprep.subr.mxu0 %v1370_v0 }
 0x2c8   :  { %1097 = vmatpush3.msra.mxu0 %v722_v27 }
 0x2c9   :  { %1098 = vmatprep.subr.mxu0 %v1370_v0 }
 0x2ca   :  { %1099 = vmatpush3.msra.mxu0 %v721_v28 }
 0x2cb   :  { %1100 = vmatprep.subr.mxu0 %v1370_v0 }
 0x2cc   :  { %1101 = vmatpush3.msra.mxu0 %v720_v29 }
 0x2cd   :  { %1102 = vmatprep.subr.mxu0 %v1370_v0 }
 0x2ce   :  { %1103 = vmatpush3.msra.mxu0 %v719_v30 }
 0x2cf   :  { %1104 = vmatprep.subr.mxu0 %v1370_v0 }
 0x2d0   :  { %1105 = vmatpush3.msra.mxu0 %v718_v31 }
 0x2d1   :  { %1106 = vmatprep.subr.mxu0 %v1370_v0 }
 0x2d2   :  { %1107 = vmatpush3.msra.mxu0 %v717_v32 }
 0x2d3   :  { %1108 = vmatprep.subr.mxu0 %v1370_v0 }
 0x2d4   :  { %1109 = vmatpush3.msra.mxu0 %v716_v33 }
 0x2d5   :  { %1110 = vmatprep.subr.mxu0 %v1370_v0 }
 0x2d6   :  { %1111 = vmatpush3.msra.mxu0 %v715_v34 }
 0x2d7   :  { %1112 = vmatprep.subr.mxu0 %v1370_v0 }
 0x2d8   :  { %1113 = vmatpush3.msra.mxu0 %v714_v35 }
 0x2d9   :  { %1114 = vmatprep.subr.mxu0 %v1370_v0 }
 0x2da   :  { %1115 = vmatpush3.msra.mxu0 %v713_v36 }
 0x2db   :  { %1116 = vmatprep.subr.mxu0 %v1370_v0 }
 0x2dc   :  { %1117 = vmatpush3.msra.mxu0 %v712_v37 }
 0x2dd   :  { %1118 = vmatprep.subr.mxu0 %v1370_v0 }
 0x2de   :  { %1119 = vmatpush3.msra.mxu0 %v711_v43 }
 0x2df   :  { %1120 = vmatprep.subr.mxu0 %v1370_v0 }
 0x2e0   :  { %1121 = vmatpush3.msra.mxu0 %v710_v44 }
 0x2e1   :  { %1122 = vmatprep.subr.mxu0 %v1370_v0 }
 0x2e2   :  { %1123 = vmatpush3.msra.mxu0 %v709_v45 }
 0x2e3   :  { %1124 = vmatprep.subr.mxu0 %v1370_v0 }
 0x2e4   :  { %1125 = vmatpush3.msra.mxu0 %v708_v46 }
 0x385   :  { %v608_v39 = vpop.f32.mrf.mxu0 }
 0x386   :  { %v609_v40 = vadd.f32 %v846_v38, %v608_v39 }
 0x387   :  { %v1058_v41 = vpop.f32.mrf.mxu0 }
 0x388   :  { %v612_v42 = vmax.f32 %v609_v40, 0.0 }
 0x38a   :  { %1092 = vmatmul.mubr.f32.vlgmr.msra.gmra.mxu1 %v612_v42 }
 0x44a   :  { %v702_v48 = vpop.f32.mrf.mxu1 }
 0x44b   :  { %v703_v49 = vadd.f32 %v847_v47, %v702_v48 }
 0x44c   :  { %v1093_v50 = vpop.f32.mrf.mxu1 }
 0x44d   :  { %v706_v51 = vmax.f32 %v703_v49, 0.0 }
 0x44f   :  { %v707_v52 = vadd.f32 %v706_v51, %v1595_v22 }
 0x451   :  { %1127 = vmatmul.mubr.f32.vlgmr.msra.gmra.mxu0 %v707_v52 }
 0x511   :  { %v797_v54 = vpop.f32.mrf.mxu0 }
 0x512   :  { %v798_v55 = vadd.f32 %v848_v53, %v797_v54 }
 0x513   :  { %v1128_v0 = vpop.f32.mrf.mxu0 }
 0x514   :  { %v805_v56 = vand.u32 2147483647, %v798_v55  ;;  %v804_v6 = vmax.f32 %v798_v55, 0.0 }
 0x516   :  { %v806_v57 = vsub.f32 0.0, %v805_v56 }
 0x518   :  { %v807_v58 = vmul.f32 1.442695, %v806_v57 }
 0x51a   :  { %1143 = vpow2.f32 %v807_v58 }
 0x527   :  { %v1144_v59 = vpop.eup %1143 }
 0x528   :  { %v809_v60 = vadd.f32 1.0, %v1144_v59  ;;  %v812_v61 = vmul.f32 -0.5, %v1144_v59  ;;  %v815_v1 = vand.u32 2147483647, %v1144_v59 }
 0x52a   :  { %1145 = vlog2.f32 %v809_v60  ;;  %v813_v62 = vadd.f32 1.0, %v812_v61  ;;  %vm816_vm2 = vcmp.lt.f32.partialorder %v815_v1, 0.0004427343 }
 0x52c   :  { %v814_v4 = vmul.f32 %v1144_v59, %v813_v62 }
 0x537   :  { %v1146_v2 = vpop.eup %1145 }
 0x538   :  { %v811_v3 = vmul.f32 0.6931472, %v1146_v2 }
 0x53a   :  { %v817_v7 = vsel %vm816_vm2, %v814_v4, %v811_v3 }
 0x53b   :  { %v818_v8 = vadd.f32 %v817_v7, %v804_v6 }
 0x53d   :  { %v819_v9 = vadd.f32 1e-07, %v818_v8 }
 0x53f   :  { %v820_v10 = vsel %vm803_vm3, %v798_v55, %v819_v9 }
 0x540   :  { %821 = vst [vmem:[#allocation17] sm:$0xff] %v820_v10 }
 0x541   :  { %1338 = shalt.err (!%p1335_p7)
}
 0x542   :  { %831 = dma.vmem_to_hbm [thread:$0]  %s829_s14, 128, %s1645_s15, [#allocation4]  }
 0x543   :  { %1357 = dma.done.wait [#allocation4], 128  }
 0x544   :  { %1358 = vsyncadd [#allocation4], 4294967168 }
 0x545   :  { %835 = vsyncpa [#allocation3], 1 }
 0x546   :  { %836 = vsyncpa [#allocation6], 1 }
 0x547   :  { %837 = vsyncpa [#allocation9], 1 }
 0x548   :  { %838 = vsyncpa [#allocation12], 1 }
 0x549   :  { %839 = vsyncpa [#allocation15], 1 }
 0x54a   :  { %840 = vsyncpa [#allocation4], 1 }

</bundles_post_ra>
